<compile_context>
chip_gen: v7x
topology: tpu7x:2x2x1
jax: 0.10.0
libtpu: 0.0.40
codegen_flags: <defaults>
</compile_context>

<pallas_src>
import math

import jax
import jax.numpy as jnp
from jax.experimental import pallas as pl
from jax.experimental.pallas import tpu as pltpu

_GELU_C = (2.0 / math.pi) ** 0.5


def _gelu_tanh(x):
    # Exact tanh-approximation GELU as written in the PyTorch module.
    return 0.5 * x * (1.0 + jnp.tanh(_GELU_C * (x + 0.044715 * x * x * x)))


# ----------------------------------------------------------------------------
# Kernels
# ----------------------------------------------------------------------------
def _fused_kernel(x_ref, w_ref, b_ref, skip_ref, o_ref):
    """Single K pass (tk == D): dot -> bias -> GELU -> residual -> GELU."""
    acc = jnp.dot(x_ref[...].astype(jnp.bfloat16), w_ref[...],
                  preferred_element_type=jnp.float32)
    h = acc + b_ref[...].astype(jnp.float32)
    h = _gelu_tanh(h)
    h = h + skip_ref[...].astype(jnp.float32)
    o_ref[...] = _gelu_tanh(h).astype(o_ref.dtype)


def _tiled_kernel(x_ref, w_ref, b_ref, skip_ref, o_ref, acc_ref):
    """K-tiled path: f32 accumulator scratch, bias folded into init."""
    k = pl.program_id(2)

    @pl.when(k == 0)
    def _():
        # Bias as accumulator init (replaces zero-fill + epilogue bias add).
        acc_ref[...] = jnp.broadcast_to(b_ref[...].astype(jnp.float32),
                                        acc_ref.shape)

    acc_ref[...] += jnp.dot(x_ref[...].astype(jnp.bfloat16), w_ref[...],
                            preferred_element_type=jnp.float32)

    @pl.when(k == pl.num_programs(2) - 1)
    def _():
        h = _gelu_tanh(acc_ref[...])
        h = h + skip_ref[...].astype(jnp.float32)
        o_ref[...] = _gelu_tanh(h).astype(o_ref.dtype)


# ----------------------------------------------------------------------------
# Tile / hardware helpers
# ----------------------------------------------------------------------------
def _pick_tile(total, preferred, multiples):
    """Largest t <= preferred with t % m == 0 (preferring earlier m in
    `multiples`) and total % t == 0; falls back to the full extent."""
    if total <= preferred:
        return total
    for m in multiples:
        t = (min(preferred, total) // m) * m
        while t >= m:
            if total % t == 0:
                return t
            t -= m
    return total


def _physical_vmem_bytes():
    try:
        return int(pltpu.get_tpu_info().vmem_capacity_bytes)
    except Exception:
        return 64 * 1024 * 1024  # conservative default (v7x per-TensorCore)


def _num_tensorcores():
    # v7x has 2 TensorCores per chip sharded over the "parallel" grid axes.
    try:
        kind = jax.devices()[0].device_kind.lower()
        if "v7" in kind:
            return 2
    except Exception:
        pass
    return 1


# ----------------------------------------------------------------------------
# Wrapper
# ----------------------------------------------------------------------------
def residual_linear_block(x, x_skip, w_t, b, *,
                          block_rows=None, block_n=None, block_k=None):
    """x, x_skip: [B, D]; w_t: [D, D] (= PyTorch weight transposed, ideally
    pre-cast to bf16 once at init); b: [D]."""
    B, D = x.shape
    assert x_skip.shape == (B, D) and w_t.shape == (D, D) and b.shape == (D,)

    # Weight should arrive in bf16 (cast once at parameter init).  Cast here
    # only as a fallback so the wrapper stays correct for f32 weights.
    w_bf = w_t if w_t.dtype == jnp.bfloat16 else w_t.astype(jnp.bfloat16)
    b2 = b.reshape(1, D)

    auto_tiles = block_rows is None and block_n is None and block_k is None
    # Prefer 256-aligned N/K tiles (v6e/v7x 256x256 MXU); 128 still legal.
    bm = block_rows if block_rows is not None else _pick_tile(B, 512, (8,))
    tn = block_n if block_n is not None else _pick_tile(D, 512, (256, 128))
    tk = block_k if block_k is not None else _pick_tile(D, D, (256, 128))

    # v7x: keep both TensorCores busy -> >= 2 blocks on the parallel axes.
    if auto_tiles and _num_tensorcores() >= 2 and (B // bm) * (D // tn) < 2:
        half = bm // 2
        if half >= 8 and half % 8 == 0 and B % half == 0:
            bm = half
        else:
            half_n = tn // 2
            if half_n >= 128 and half_n % 128 == 0 and D % half_n == 0:
                tn = half_n

    assert B % bm == 0 and D % tn == 0 and D % tk == 0
    assert bm == B or bm % 8 == 0        # sublane constraint
    assert tn == D or tn % 128 == 0      # lane constraint
    assert tk == D or tk % 128 == 0

    nk = D // tk
    out_dtype = x.dtype

    # VMEM budget: double-buffered inputs/outputs (+ f32 accumulator if K-tiled).
    vmem_bytes = (
        2 * bm * tk * x.dtype.itemsize          # x tiles (native dtype)
        + 2 * tk * tn * 2                       # weight tiles (bf16)
        + 2 * 1 * tn * b2.dtype.itemsize        # bias
        + 2 * bm * tn * x_skip.dtype.itemsize   # skip tiles (native dtype)
        + 2 * bm * tn * jnp.dtype(out_dtype).itemsize  # output tiles
        + (bm * tn * 4 if nk > 1 else 0)        # accumulator scratch
    )
    phys = _physical_vmem_bytes()
    vmem_limit = int(min(max(2 * vmem_bytes, 8 * 1024 * 1024), phys // 2))

    cost = pl.CostEstimate(
        flops=2 * B * D * D + 8 * B * D,
        transcendentals=2 * B * D,
        bytes_accessed=(x.size * x.dtype.itemsize + w_bf.size * 2
                        + b2.size * b2.dtype.itemsize
                        + x_skip.size * x_skip.dtype.itemsize
                        + B * D * jnp.dtype(out_dtype).itemsize),
    )

    if nk == 1:
        # Fast path: no reduction axis, no accumulator scratch.
        grid = (B // bm, D // tn)
        grid_spec = pltpu.PrefetchScalarGridSpec(
            num_scalar_prefetch=0,
            grid=grid,
            in_specs=[
                pl.BlockSpec((bm, D), lambda i, j: (i, 0)),    # x row tile
                pl.BlockSpec((D, tn), lambda i, j: (0, j)),    # W^T col tile (bf16)
                pl.BlockSpec((1, tn), lambda i, j: (0, j)),    # bias tile
                pl.BlockSpec((bm, tn), lambda i, j: (i, j)),   # skip tile
            ],
            out_specs=pl.BlockSpec((bm, tn), lambda i, j: (i, j)),
        )
        kernel = _fused_kernel
        dim_sem = ("parallel", "parallel")
    else:
        grid = (B // bm, D // tn, nk)
        grid_spec = pltpu.PrefetchScalarGridSpec(
            num_scalar_prefetch=0,
            grid=grid,
            in_specs=[
                pl.BlockSpec((bm, tk), lambda i, j, k: (i, k)),   # x tile
                pl.BlockSpec((tk, tn), lambda i, j, k: (k, j)),   # W^T tile (bf16)
                pl.BlockSpec((1, tn), lambda i, j, k: (0, j)),    # bias tile
                pl.BlockSpec((bm, tn), lambda i, j, k: (i, j)),   # skip tile
            ],
            out_specs=pl.BlockSpec((bm, tn), lambda i, j, k: (i, j)),
            scratch_shapes=[pltpu.VMEM((bm, tn), jnp.float32)],   # f32 accumulator
        )
        kernel = _tiled_kernel
        dim_sem = ("parallel", "parallel", "arbitrary")

    return pl.pallas_call(
        kernel,
        out_shape=jax.ShapeDtypeStruct((B, D), out_dtype),
        grid_spec=grid_spec,
        compiler_params=pltpu.CompilerParams(
            dimension_semantics=dim_sem,
            vmem_limit_bytes=vmem_limit,
        ),
        cost_estimate=cost,
    )(x, w_bf, b2, x_skip)


def reference(x, x_skip, w_t, b):
    h = x @ w_t + b
    h = _gelu_tanh(h)
    h = h + x_skip
    return _gelu_tanh(h)


if __name__ == "__main__":
    key = jax.random.PRNGKey(0)
    kx, ks, kw, kb = jax.random.split(key, 4)

    def make_case(B, D, kx, ks, kw, kb):
        x = jax.random.normal(kx, (B, D), dtype=jnp.float32)
        x_skip = jax.random.normal(ks, (B, D), dtype=jnp.float32)
        # nn.Linear-style uniform(-1/sqrt(D), 1/sqrt(D)); store W^T as [in, out].
        bound = 1.0 / math.sqrt(D)
        w = jax.random.uniform(kw, (D, D), minval=-bound, maxval=bound,
                               dtype=jnp.float32)
        b = jax.random.uniform(kb, (D,), minval=-bound, maxval=bound,
                               dtype=jnp.float32)
        return x, x_skip, w.T, b

    def check(out, x, x_skip, w_t, b):
        # Tight check: same bf16-quantized MXU operands, f32 everywhere else.
        ref_q = reference(x.astype(jnp.bfloat16).astype(jnp.float32), x_skip,
                          w_t.astype(jnp.bfloat16).astype(jnp.float32), b)
        assert jnp.allclose(out, ref_q, atol=1e-3, rtol=1e-3), \
            "mismatch vs quantized reference"
        # Loose check vs the full-f32 PyTorch-equivalent reference.
        ref = reference(x, x_skip, w_t, b)
        assert jnp.allclose(out, ref, atol=5e-2, rtol=5e-2), \
            "mismatch vs f32 reference"

    # --- Small case (fused single-K-pass kernel), shapes consistent w/ module.
    x, x_skip, w_t, b = make_case(64, 128, kx, ks, kw, kb)
    # Weight cast to bf16 ONCE here ("parameter init"), reused by every call.
    w_bf = w_t.astype(jnp.bfloat16)
    out = residual_linear_block(x, x_skip, w_bf, b)
    out = jax.block_until_ready(out)
    check(out, x, x_skip, w_t, b)

    # --- Small K-tiled case to exercise the accumulator path as well.
    x2, x_skip2, w_t2, b2 = make_case(64, 256, ks, kx, kb, kw)
    w_bf2 = w_t2.astype(jnp.bfloat16)
    out2 = residual_linear_block(x2, x_skip2, w_bf2, b2,
                                 block_rows=32, block_n=128, block_k=128)
    out2 = jax.block_until_ready(out2)
    check(out2, x2, x_skip2, w_t2, b2)

    print("KERNEL_OK")
</pallas_src>

<mosaic_0001>
module attributes {stable_mosaic.version = 11 : i64} {
  func.func @_fused_kernel(%arg0: i32, %arg1: i32, %arg2: memref<64x128xf32, #tpu.memory_space<vmem>>, %arg3: memref<128x128xbf16, #tpu.memory_space<vmem>>, %arg4: memref<1x128xf32, #tpu.memory_space<vmem>>, %arg5: memref<64x128xf32, #tpu.memory_space<vmem>>, %arg6: memref<64x128xf32, #tpu.memory_space<vmem>>) attributes {dimension_semantics = [#tpu.dimension_semantics<parallel>, #tpu.dimension_semantics<parallel>], iteration_bounds = array<i64: 1, 1>, scalar_prefetch = 0 : i64, scratch_operands = 0 : i64, tpu.core_type = #tpu.core_type<tc>, window_params = [{transform_indices = @transform_0, window_bounds = array<i64: 64, 128>}, {transform_indices = @transform_1, window_bounds = array<i64: 128, 128>}, {transform_indices = @transform_2, window_bounds = array<i64: 1, 128>}, {transform_indices = @transform_3, window_bounds = array<i64: 64, 128>}, {transform_indices = @transform_4, window_bounds = array<i64: 64, 128>}]} {
    %c0 = arith.constant 0 : index
    %c0_0 = arith.constant 0 : index
    %0 = vector.load %arg2[%c0, %c0_0] : memref<64x128xf32, #tpu.memory_space<vmem>>, vector<64x128xf32>
    %1 = arith.truncf %0 : vector<64x128xf32> to vector<64x128xbf16>
    %c0_1 = arith.constant 0 : index
    %c0_2 = arith.constant 0 : index
    %2 = vector.load %arg3[%c0_1, %c0_2] : memref<128x128xbf16, #tpu.memory_space<vmem>>, vector<128x128xbf16>
    %cst = arith.constant dense<0.000000e+00> : vector<64x128xf32>
    %3 = tpu.matmul %1, %2, %cst {dimension_numbers = #tpu.dot_dimension_numbers<[1], [0], [0], [1], [0, 0, 1, 1], [], []>} : vector<64x128xbf16>, vector<128x128xbf16>, vector<64x128xf32> -> vector<64x128xf32>
    %c0_3 = arith.constant 0 : index
    %c0_4 = arith.constant 0 : index
    %4 = vector.load %arg4[%c0_3, %c0_4] : memref<1x128xf32, #tpu.memory_space<vmem>>, vector<1x128xf32>
    %5 = vector.broadcast %4 : vector<1x128xf32> to vector<64x128xf32>
    %6 = arith.addf %3, %5 : vector<64x128xf32>
    %cst_5 = arith.constant 5.000000e-01 : f32
    %7 = vector.broadcast %cst_5 : f32 to vector<64x128xf32>
    %8 = arith.mulf %7, %6 : vector<64x128xf32>
    %cst_6 = arith.constant 4.471500e-02 : f32
    %9 = vector.broadcast %cst_6 : f32 to vector<64x128xf32>
    %10 = arith.mulf %9, %6 : vector<64x128xf32>
    %11 = arith.mulf %10, %6 : vector<64x128xf32>
    %12 = arith.mulf %11, %6 : vector<64x128xf32>
    %13 = arith.addf %6, %12 : vector<64x128xf32>
    %cst_7 = arith.constant 0.797884583 : f32
    %14 = vector.broadcast %cst_7 : f32 to vector<64x128xf32>
    %15 = arith.mulf %14, %13 : vector<64x128xf32>
    %16 = math.tanh %15 : vector<64x128xf32>
    %cst_8 = arith.constant 1.000000e+00 : f32
    %17 = vector.broadcast %cst_8 : f32 to vector<64x128xf32>
    %18 = arith.addf %17, %16 : vector<64x128xf32>
    %19 = arith.mulf %8, %18 : vector<64x128xf32>
    %c0_9 = arith.constant 0 : index
    %c0_10 = arith.constant 0 : index
    %20 = vector.load %arg5[%c0_9, %c0_10] : memref<64x128xf32, #tpu.memory_space<vmem>>, vector<64x128xf32>
    %21 = arith.addf %19, %20 : vector<64x128xf32>
    %cst_11 = arith.constant 5.000000e-01 : f32
    %22 = vector.broadcast %cst_11 : f32 to vector<64x128xf32>
    %23 = arith.mulf %22, %21 : vector<64x128xf32>
    %cst_12 = arith.constant 4.471500e-02 : f32
    %24 = vector.broadcast %cst_12 : f32 to vector<64x128xf32>
    %25 = arith.mulf %24, %21 : vector<64x128xf32>
    %26 = arith.mulf %25, %21 : vector<64x128xf32>
    %27 = arith.mulf %26, %21 : vector<64x128xf32>
    %28 = arith.addf %21, %27 : vector<64x128xf32>
    %cst_13 = arith.constant 0.797884583 : f32
    %29 = vector.broadcast %cst_13 : f32 to vector<64x128xf32>
    %30 = arith.mulf %29, %28 : vector<64x128xf32>
    %31 = math.tanh %30 : vector<64x128xf32>
    %cst_14 = arith.constant 1.000000e+00 : f32
    %32 = vector.broadcast %cst_14 : f32 to vector<64x128xf32>
    %33 = arith.addf %32, %31 : vector<64x128xf32>
    %34 = arith.mulf %23, %33 : vector<64x128xf32>
    %c0_15 = arith.constant 0 : index
    %c0_16 = arith.constant 0 : index
    %35 = vector.load %arg6[%c0_15, %c0_16] : memref<64x128xf32, #tpu.memory_space<vmem>>, vector<64x128xf32>
    tpu.vector_store %arg6[%c0_15, %c0_16], %34 {strides = array<i32>} : memref<64x128xf32, #tpu.memory_space<vmem>>, vector<64x128xf32>,
    return
  }
  func.func @transform_0(%arg0: i32, %arg1: i32) -> (i32, i32) {
    %c0_i32 = arith.constant 0 : i32
    %c0_i32_0 = arith.constant 0 : i32
    return %arg0, %c0_i32 : i32, i32
  }
  func.func @transform_1(%arg0: i32, %arg1: i32) -> (i32, i32) {
    %c0_i32 = arith.constant 0 : i32
    %c0_i32_0 = arith.constant 0 : i32
    return %c0_i32, %arg1 : i32, i32
  }
  func.func @transform_2(%arg0: i32, %arg1: i32) -> (i32, i32) {
    %c0_i32 = arith.constant 0 : i32
    %c0_i32_0 = arith.constant 0 : i32
    return %c0_i32, %arg1 : i32, i32
  }
  func.func @transform_3(%arg0: i32, %arg1: i32) -> (i32, i32) {
    %c0_i32 = arith.constant 0 : i32
    return %arg0, %arg1 : i32, i32
  }
  func.func @transform_4(%arg0: i32, %arg1: i32) -> (i32, i32) {
    %c0_i32 = arith.constant 0 : i32
    return %arg0, %arg1 : i32, i32
  }
}

</mosaic_0001>

<bundles_post_ra>
// kernel: tpu_custom_call.1
= control target key start
LH: loop header
LB: loop body
LE: loop exit
PB: predicated region body
PF: predicated region fallthrough
CT: control target
= control target key end

     0   :  { %9 = vsyncpa [#allocation3], 0  ;;  %s802_s0 = inlined_call_operand.hbm [shape: f32[64,128], index: 0, kind: input, shape index: {}]   ;;  %s803_s1 = inlined_call_operand.hbm [shape: bf16[128,128], index: 1, kind: input, shape index: {}]   ;;  %s804_s2 = inlined_call_operand.vmem [shape: f32[1,128], index: 2, kind: input, shape index: {}]   ;;  %s805_s3 = inlined_call_operand.hbm [shape: f32[64,128], index: 3, kind: input, shape index: {}]   ;;  %s806_s4 = inlined_call_operand.hbm [shape: f32[64,128], index: 4, kind: output, shape index: {}]  }
   0x1   :  { %10 = vsyncpa [#allocation6], 0 }
   0x2   :  { %11 = vsyncpa [#allocation4], 0  ;;  %s597_s15 = smov [#allocation5]   ;;  %s503_s19 = scalar_lea.hbm %s803_s1, 1024 }
   0x3   :  { %s29_s16 = sshll.u32 %s597_s15, 4  ;;  %p504_p0 = scmp.ne.s32.totalorder %s803_s1, %s503_s19  ;;  %s30_s16 = int_to_ptr.vmem [resolvable:$true] %s29_s16 }
   0x4   :  { %p507_p1 = scmp.lt.u32.totalorder %s503_s19, %s803_s1 }
   0x6   :  { %p509_p2 = pnand %p507_p1, %p504_p0 }
   0x8   :  { %512 = shalt.err (!%p509_p2)
}
   0x9   :  { %s513_s24 = scalar_lea.vmem %s30_s16, 1024  ;;  %p518_p4 = scmp.lt.s32.totalorder %s30_s16, %s30_s16 }
   0xa   :  { %p514_p3 = scmp.ne.s32.totalorder %s30_s16, %s513_s24  ;;  %p519_p5 = scmp.lt.s32.totalorder %s513_s24, %s513_s24 }
   0xc   :  { %p520_p6 = por %p519_p5, %p518_p4 }
   0xe   :  { %p521_p7 = pnand %p520_p6, %p514_p3 }
  0x10   :  { %524 = shalt.err (!%p521_p7)
}
  0x11   :  { %s598_s25 = smov 64   ;;  %s599_s26 = smov 4  }
  0x12   :  { %35 = dma.hbm_to_vmem [thread:$0]  %s803_s1, 1024, %s30_s16, [#allocation6], %s598_s25, %s598_s25, %s599_s26  }
  0x13   :  { %s600_s29 = smov [#allocation2]   ;;  %s525_s7 = scalar_lea.hbm %s802_s0, 1024 }
  0x14   :  { %s17_s30 = sshll.u32 %s600_s29, 4  ;;  %p526_p8 = scmp.ne.s32.totalorder %s802_s0, %s525_s7  ;;  %s18_s30 = int_to_ptr.vmem [resolvable:$true] %s17_s30 }
  0x15   :  { %p529_p9 = scmp.lt.u32.totalorder %s525_s7, %s802_s0 }
  0x17   :  { %p531_p10 = pnand %p529_p9, %p526_p8 }
  0x19   :  { %534 = shalt.err (!%p531_p10)
}
  0x1a   :  { %s535_s12 = scalar_lea.vmem %s18_s30, 1024  ;;  %p540_p12 = scmp.lt.s32.totalorder %s18_s30, %s18_s30 }
  0x1b   :  { %p536_p11 = scmp.ne.s32.totalorder %s18_s30, %s535_s12  ;;  %p541_p13 = scmp.lt.s32.totalorder %s535_s12, %s535_s12 }
  0x1d   :  { %p542_p0 = por %p541_p13, %p540_p12 }
  0x1f   :  { %p543_p1 = pnand %p542_p0, %p536_p11 }
  0x21   :  { %546 = shalt.err (!%p543_p1)
}
  0x22   :  { %s601_s1 = smov 128   ;;  %s602_s13 = smov 8  }
  0x23   :  { %23 = dma.hbm_to_vmem [thread:$0]  %s802_s0, 1024, %s18_s30, [#allocation3], %s601_s1, %s601_s1, %s602_s13  }
  0x24   :  { %s603_s16 = smov [#allocation7]   ;;  %s547_s20 = scalar_lea.hbm %s805_s3, 1024 }
  0x25   :  { %s43_s17 = sshll.u32 %s603_s16, 4  ;;  %p548_p2 = scmp.ne.s32.totalorder %s805_s3, %s547_s20  ;;  %s44_s17 = int_to_ptr.vmem [resolvable:$true] %s43_s17 }
  0x26   :  { %p551_p3 = scmp.lt.u32.totalorder %s547_s20, %s805_s3 }
  0x28   :  { %p553_p4 = pnand %p551_p3, %p548_p2 }
  0x2a   :  { %556 = shalt.err (!%p553_p4)
}
  0x2b   :  { %s557_s25 = scalar_lea.vmem %s44_s17, 1024  ;;  %p562_p6 = scmp.lt.s32.totalorder %s44_s17, %s44_s17 }
  0x2c   :  { %p558_p5 = scmp.ne.s32.totalorder %s44_s17, %s557_s25  ;;  %p563_p7 = scmp.lt.s32.totalorder %s557_s25, %s557_s25 }
  0x2e   :  { %p564_p8 = por %p563_p7, %p562_p6 }
  0x30   :  { %p565_p9 = pnand %p564_p8, %p558_p5 }
  0x32   :  { %568 = shalt.err (!%p565_p9)
}
  0x33   :  { %49 = dma.hbm_to_vmem [thread:$0]  %s805_s3, 1024, %s44_s17, [#allocation6], %s601_s1, %s601_s1, %s602_s13  }
  0x34   :  { %591 = dma.done.wait [#allocation3], 1024  }
  0x35   :  { %592 = vsyncadd [#allocation3], 4294966272 }
  0x36   :  { %593 = dma.done.wait [#allocation6], 2048  }
  0x37   :  { %594 = vsyncadd [#allocation6], 4294965248  ;;  %v463_v0 = vld [vmem:[#allocation5] sm:$0xff]   ;;  %v464_v1 = vld [vmem:[#allocation5 + $0x8] sm:$0xff]  }
  0x38   :  { %415 = vmatprep.subr.bf16.mxu0 %v463_v0  ;;  %439 = vmatprep.subr.bf16.mxu1 %v463_v0  ;;  %v465_v2 = vld [vmem:[#allocation5 + $0x10] sm:$0xff]   ;;  %v466_v3 = vld [vmem:[#allocation5 + $0x18] sm:$0xff]   ;;  %v60_v4 = vld [vmem:[#allocation2] sm:$0xff] }
  0x39   :  { %416 = vmatpush3.bf16.msra.mxu0 %v463_v0  ;;  %447 = vmatpush3.bf16.msra.mxu1 %v463_v0  ;;  %v61_v5 = vld [vmem:[#allocation2 + $0x8] sm:$0xff]  ;;  %v64_v6 = vld [vmem:[#allocation2 + $0x20] sm:$0xff]  ;;  %v469_v12 = vld [vmem:[#allocation5 + $0x30] sm:$0xff]  }
  0x3a   :  { %417 = vmatprep.subr.bf16.mxu0 %v464_v1  ;;  %440 = vmatprep.subr.bf16.mxu1 %v464_v1  ;;  %v68_v7 = vpack.c.bf16 %v61_v5, %v60_v4  ;;  %v65_v8 = vld [vmem:[#allocation2 + $0x28] sm:$0xff]  ;;  %v467_v10 = vld [vmem:[#allocation5 + $0x20] sm:$0xff]   ;;  %v470_v13 = vld [vmem:[#allocation5 + $0x38] sm:$0xff]  }
  0x3b   :  { %v70_v9 = vpack.c.bf16 %v65_v8, %v64_v6  ;;  %v468_v11 = vld [vmem:[#allocation5 + $0x28] sm:$0xff]   ;;  %v62_v14 = vld [vmem:[#allocation2 + $0x10] sm:$0xff]  ;;  %v63_v15 = vld [vmem:[#allocation2 + $0x18] sm:$0xff] }
  0x3c   :  { %431 = vmatprep.mubr.bf16.mxu0 %v68_v7  ;;  %v66_v16 = vld [vmem:[#allocation2 + $0x30] sm:$0xff]  ;;  %v67_v17 = vld [vmem:[#allocation2 + $0x38] sm:$0xff]  ;;  %v69_v18 = vpack.c.bf16 %v63_v15, %v62_v14  ;;  %v394_v20 = vld [vmem:[%s804_s2] ss:$0 sm:$0xff]  ;;  %s604_s2 = smov [#allocation8]  }
  0x3d   :  { %418 = vmatpush3.bf16.msra.mxu0 %v464_v1  ;;  %448 = vmatpush3.bf16.msra.mxu1 %v464_v1  ;;  %v71_v19 = vpack.c.bf16 %v67_v17, %v66_v16  ;;  %s381_s28 = sshll.u32 %s604_s2, 4  ;;  %s382_s28 = int_to_ptr.vmem [resolvable:$true] %s381_s28 }
  0x3e   :  { %419 = vmatprep.subr.bf16.mxu0 %v465_v2  ;;  %441 = vmatprep.subr.bf16.mxu1 %v465_v2  ;;  %s569_s29 = scalar_lea.vmem %s382_s28, 1024  ;;  %p574_p11 = scmp.lt.s32.totalorder %s382_s28, %s382_s28 }
  0x3f   :  { %435 = vmatprep.mubr.bf16.mxu1 %v70_v9  ;;  %p570_p10 = scmp.ne.s32.totalorder %s382_s28, %s569_s29  ;;  %p575_p12 = scmp.lt.s32.totalorder %s569_s29, %s569_s29 }
  0x41   :  { %420 = vmatpush3.bf16.msra.mxu0 %v465_v2  ;;  %449 = vmatpush3.bf16.msra.mxu1 %v465_v2  ;;  %p576_p13 = por %p575_p12, %p574_p11 }
  0x42   :  { %421 = vmatprep.subr.bf16.mxu0 %v466_v3  ;;  %442 = vmatprep.subr.bf16.mxu1 %v466_v3 }
  0x43   :  { %p577_p0 = pnand %p576_p13, %p570_p10 }
  0x45   :  { %422 = vmatpush3.bf16.msra.mxu0 %v466_v3  ;;  %450 = vmatpush3.bf16.msra.mxu1 %v466_v3 }
  0x46   :  { %423 = vmatprep.subr.bf16.mxu0 %v467_v10  ;;  %443 = vmatprep.subr.bf16.mxu1 %v467_v10 }
  0x49   :  { %424 = vmatpush3.bf16.msra.mxu0 %v467_v10  ;;  %451 = vmatpush3.bf16.msra.mxu1 %v467_v10 }
  0x4a   :  { %425 = vmatprep.subr.bf16.mxu0 %v468_v11  ;;  %444 = vmatprep.subr.bf16.mxu1 %v468_v11 }
  0x4d   :  { %426 = vmatpush3.bf16.msra.mxu0 %v468_v11  ;;  %452 = vmatpush3.bf16.msra.mxu1 %v468_v11 }
  0x4e   :  { %427 = vmatprep.subr.bf16.mxu0 %v469_v12  ;;  %445 = vmatprep.subr.bf16.mxu1 %v469_v12 }
  0x51   :  { %428 = vmatpush3.bf16.msra.mxu0 %v469_v12  ;;  %453 = vmatpush3.bf16.msra.mxu1 %v469_v12 }
  0x52   :  { %429 = vmatprep.subr.bf16.mxu0 %v470_v13  ;;  %446 = vmatprep.subr.bf16.mxu1 %v470_v13 }
  0x55   :  { %430 = vmatpush3.bf16.msra.mxu0 %v470_v13  ;;  %454 = vmatpush3.bf16.msra.mxu1 %v470_v13 }
  0x58   :  { %432 = vmatmul.mubr.bf16.vlgmr.msra.gmra.mrb[0].mxu0 %v69_v18  ;;  %436 = vmatmul.mubr.bf16.vlgmr.msra.gmra.mrb[0].mxu1 %v71_v19  ;;  %v282_v18 = vld [vmem:[#allocation7 + $0x10] sm:$0xff] }
 0x12b   :  { %v433_v21 = vpop.f32.mrb[0].mxu0  ;;  %v437_v22 = vpop.f32.mrb[0].mxu1 }
 0x12c   :  { %v675_v23 = vadd.f32 %v433_v21, %v394_v20  ;;  %v677_v24 = vadd.f32 %v437_v22, %v394_v20  ;;  %v177_v25 = vpop.f32.mrb[1].mxu0  ;;  %v193_v26 = vpop.f32.mrb[1].mxu1 }
 0x12d   :  { %v679_v27 = vadd.f32 %v394_v20, %v177_v25  ;;  %v681_v28 = vadd.f32 %v394_v20, %v193_v26  ;;  %v434_v29 = vpop.f32.mrb[2].mxu0  ;;  %v438_v30 = vpop.f32.mrb[2].mxu1  ;;  %v286_v25 = vld [vmem:[#allocation7 + $0x30] sm:$0xff] }
 0x12e   :  { %v218_v31 = vmul.f32 0.044715, %v675_v23  ;;  %v222_v32 = vmul.f32 0.044715, %v677_v24  ;;  %v689_v37 = vadd.f32 %v434_v29, %v394_v20  ;;  %v691_v38 = vadd.f32 %v438_v30, %v394_v20  ;;  %v180_v39 = vpop.f32.mrb[3].mxu0  ;;  %v196_v40 = vpop.f32.mrb[3].mxu1 }
 0x12f   :  { %v216_v33 = vmul.f32 0.044715, %v679_v27  ;;  %v220_v34 = vmul.f32 0.044715, %v681_v28  ;;  %v695_v43 = vadd.f32 %v394_v20, %v180_v39  ;;  %v706_v53 = vadd.f32 %v394_v20, %v196_v40  ;;  %v284_v39 = vld [vmem:[#allocation7 + $0x20] sm:$0xff] }
 0x130   :  { %v226_v35 = vmul.f32 %v218_v31, %v675_v23  ;;  %v230_v36 = vmul.f32 %v222_v32, %v677_v24  ;;  %v219_v46 = vmul.f32 0.044715, %v689_v37  ;;  %v223_v49 = vmul.f32 0.044715, %v691_v38  ;;  %v280_v32 = vld [vmem:[#allocation7] sm:$0xff] }
 0x131   :  { %v224_v41 = vmul.f32 %v216_v33, %v679_v27  ;;  %v228_v42 = vmul.f32 %v220_v34, %v681_v28  ;;  %v217_v57 = vmul.f32 0.044715, %v695_v43  ;;  %v221_v2 = vmul.f32 0.044715, %v706_v53 }
 0x132   :  { %v234_v44 = vmul.f32 %v226_v35, %v675_v23  ;;  %v238_v45 = vmul.f32 %v230_v36, %v677_v24  ;;  %v227_v52 = vmul.f32 %v219_v46, %v689_v37  ;;  %v231_v56 = vmul.f32 %v223_v49, %v691_v38  ;;  %v287_v49 = vld [vmem:[#allocation7 + $0x38] sm:$0xff] }
 0x133   :  { %v232_v47 = vmul.f32 %v224_v41, %v679_v27  ;;  %v236_v48 = vmul.f32 %v228_v42, %v681_v28  ;;  %v225_v0 = vmul.f32 %v217_v57, %v695_v43  ;;  %v229_v6 = vmul.f32 %v221_v2, %v706_v53  ;;  %v281_v57 = vld [vmem:[#allocation7 + $0x8] sm:$0xff] }
 0x134   :  { %v242_v50 = vadd.f32 %v234_v44, %v675_v23  ;;  %v246_v51 = vadd.f32 %v238_v45, %v677_v24  ;;  %v235_v60 = vmul.f32 %v227_v52, %v689_v37  ;;  %v239_v63 = vmul.f32 %v231_v56, %v691_v38  ;;  %v283_v44 = vld [vmem:[#allocation7 + $0x18] sm:$0xff] }
 0x135   :  { %v240_v54 = vadd.f32 %v232_v47, %v679_v27  ;;  %v244_v55 = vadd.f32 %v236_v48, %v681_v28  ;;  %v233_v4 = vmul.f32 %v225_v0, %v695_v43  ;;  %v237_v9 = vmul.f32 %v229_v6, %v706_v53  ;;  %v285_v6 = vld [vmem:[#allocation7 + $0x28] sm:$0xff] }
 0x136   :  { %v250_v58 = vmul.f32 0.7978846, %v242_v50  ;;  %v254_v59 = vmul.f32 0.7978846, %v246_v51  ;;  %v243_v1 = vadd.f32 %v235_v60, %v689_v37  ;;  %v247_v3 = vadd.f32 %v239_v63, %v691_v38 }
 0x137   :  { %v248_v61 = vmul.f32 0.7978846, %v240_v54  ;;  %v252_v62 = vmul.f32 0.7978846, %v244_v55  ;;  %v241_v8 = vadd.f32 %v233_v4, %v695_v43  ;;  %v245_v11 = vadd.f32 %v237_v9, %v706_v53 }
 0x138   :  { %471 = vtanh.f32 %v250_v58  ;;  %v251_v5 = vmul.f32 0.7978846, %v243_v1  ;;  %v255_v7 = vmul.f32 0.7978846, %v247_v3  ;;  %v210_v15 = vmul.f32 0.5, %v675_v23 }
 0x139   :  { %473 = vtanh.f32 %v254_v59  ;;  %v249_v10 = vmul.f32 0.7978846, %v241_v8  ;;  %v253_v12 = vmul.f32 0.7978846, %v245_v11  ;;  %v214_v19 = vmul.f32 0.5, %v677_v24 }
 0x13a   :  { %475 = vtanh.f32 %v248_v61  ;;  %v208_v26 = vmul.f32 0.5, %v679_v27  ;;  %v212_v33 = vmul.f32 0.5, %v681_v28  ;;  %v211_v24 = vmul.f32 0.5, %v689_v37 }
 0x13b   :  { %477 = vtanh.f32 %v252_v62  ;;  %v215_v27 = vmul.f32 0.5, %v691_v38  ;;  %v209_v50 = vmul.f32 0.5, %v695_v43  ;;  %v213_v58 = vmul.f32 0.5, %v706_v53 }
 0x13c   :  { %479 = vtanh.f32 %v251_v5 }
 0x13d   :  { %481 = vtanh.f32 %v255_v7 }
 0x13e   :  { %483 = vtanh.f32 %v249_v10 }
 0x13f   :  { %485 = vtanh.f32 %v253_v12 }
 0x142   :  { %v472_v13 = vpop.eup %471 }
 0x143   :  { %v474_v14 = vpop.eup %473  ;;  %v266_v16 = vadd.f32 1.0, %v472_v13 }
 0x144   :  { %v476_v17 = vpop.eup %475  ;;  %v270_v20 = vadd.f32 1.0, %v474_v14 }
 0x145   :  { %v478_v21 = vpop.eup %477  ;;  %v274_v22 = vmul.f32 %v266_v16, %v210_v15  ;;  %v264_v29 = vadd.f32 1.0, %v476_v17 }
 0x146   :  { %v480_v30 = vpop.eup %479  ;;  %v278_v31 = vmul.f32 %v270_v20, %v214_v19  ;;  %v268_v34 = vadd.f32 1.0, %v478_v21 }
 0x147   :  { %v482_v35 = vpop.eup %481  ;;  %v727_v23 = vadd.f32 %v282_v18, %v274_v22  ;;  %v272_v36 = vmul.f32 %v264_v29, %v208_v26  ;;  %v267_v40 = vadd.f32 1.0, %v480_v30 }
 0x148   :  { %v730_v41 = vadd.f32 %v286_v25, %v278_v31  ;;  %v276_v42 = vmul.f32 %v268_v34, %v212_v33  ;;  %v271_v45 = vadd.f32 1.0, %v482_v35  ;;  %v484_v46 = vpop.eup %483 }
 0x149   :  { %v306_v47 = vmul.f32 0.044715, %v727_v23  ;;  %v734_v28 = vadd.f32 %v280_v32, %v272_v36  ;;  %v275_v48 = vmul.f32 %v267_v40, %v211_v24  ;;  %v265_v54 = vadd.f32 1.0, %v484_v46  ;;  %v486_v59 = vpop.eup %485 }
 0x14a   :  { %v310_v51 = vmul.f32 0.044715, %v730_v41  ;;  %v738_v37 = vadd.f32 %v284_v39, %v276_v42  ;;  %v279_v52 = vmul.f32 %v271_v45, %v215_v27  ;;  %v269_v2 = vadd.f32 1.0, %v486_v59 }
 0x14b   :  { %v314_v55 = vmul.f32 %v306_v47, %v727_v23  ;;  %v304_v38 = vmul.f32 0.044715, %v734_v28  ;;  %v742_v56 = vadd.f32 %v283_v44, %v275_v48  ;;  %v273_v62 = vmul.f32 %v265_v54, %v209_v50 }
 0x14c   :  { %v318_v60 = vmul.f32 %v310_v51, %v730_v41  ;;  %v308_v43 = vmul.f32 0.044715, %v738_v37  ;;  %v747_v61 = vadd.f32 %v287_v49, %v279_v52  ;;  %v277_v10 = vmul.f32 %v269_v2, %v213_v58 }
 0x14d   :  { %v322_v63 = vmul.f32 %v314_v55, %v727_v23  ;;  %v312_v0 = vmul.f32 %v304_v38, %v734_v28  ;;  %v307_v1 = vmul.f32 0.044715, %v742_v56  ;;  %v755_v5 = vadd.f32 %v281_v57, %v273_v62 }
 0x14e   :  { %v326_v3 = vmul.f32 %v318_v60, %v730_v41  ;;  %v316_v4 = vmul.f32 %v308_v43, %v738_v37  ;;  %v311_v53 = vmul.f32 0.044715, %v747_v61  ;;  %v766_v18 = vadd.f32 %v285_v6, %v277_v10 }
 0x14f   :  { %v330_v7 = vadd.f32 %v322_v63, %v727_v23  ;;  %v320_v8 = vmul.f32 %v312_v0, %v734_v28  ;;  %v315_v9 = vmul.f32 %v307_v1, %v742_v56  ;;  %v305_v14 = vmul.f32 0.044715, %v755_v5 }
 0x150   :  { %v334_v11 = vadd.f32 %v326_v3, %v730_v41  ;;  %v324_v12 = vmul.f32 %v316_v4, %v738_v37  ;;  %v319_v13 = vmul.f32 %v311_v53, %v747_v61  ;;  %v309_v29 = vmul.f32 0.044715, %v766_v18 }
 0x151   :  { %v338_v15 = vmul.f32 0.7978846, %v330_v7  ;;  %v328_v16 = vadd.f32 %v320_v8, %v734_v28  ;;  %v323_v17 = vmul.f32 %v315_v9, %v742_v56  ;;  %v313_v22 = vmul.f32 %v305_v14, %v755_v5 }
 0x152   :  { %v342_v19 = vmul.f32 0.7978846, %v334_v11  ;;  %v332_v20 = vadd.f32 %v324_v12, %v738_v37  ;;  %v327_v21 = vmul.f32 %v319_v13, %v747_v61  ;;  %v317_v34 = vmul.f32 %v309_v29, %v766_v18 }
 0x153   :  { %487 = vtanh.f32 %v338_v15  ;;  %v336_v25 = vmul.f32 0.7978846, %v328_v16  ;;  %v331_v26 = vadd.f32 %v323_v17, %v742_v56  ;;  %v321_v32 = vmul.f32 %v313_v22, %v755_v5 }
 0x154   :  { %489 = vtanh.f32 %v342_v19  ;;  %v340_v30 = vmul.f32 0.7978846, %v332_v20  ;;  %v335_v31 = vadd.f32 %v327_v21, %v747_v61  ;;  %v325_v39 = vmul.f32 %v317_v34, %v766_v18 }
 0x155   :  { %491 = vtanh.f32 %v336_v25  ;;  %v339_v33 = vmul.f32 0.7978846, %v331_v26  ;;  %v329_v36 = vadd.f32 %v321_v32, %v755_v5  ;;  %v298_v45 = vmul.f32 0.5, %v727_v23 }
 0x156   :  { %493 = vtanh.f32 %v340_v30  ;;  %v343_v35 = vmul.f32 0.7978846, %v335_v31  ;;  %v333_v40 = vadd.f32 %v325_v39, %v766_v18  ;;  %v302_v48 = vmul.f32 0.5, %v730_v41 }
 0x157   :  { %495 = vtanh.f32 %v339_v33  ;;  %v337_v24 = vmul.f32 0.7978846, %v329_v36  ;;  %v296_v51 = vmul.f32 0.5, %v734_v28  ;;  %v300_v38 = vmul.f32 0.5, %v738_v37 }
 0x158   :  { %497 = vtanh.f32 %v343_v35  ;;  %v341_v42 = vmul.f32 0.7978846, %v333_v40  ;;  %v299_v60 = vmul.f32 0.5, %v742_v56  ;;  %v303_v62 = vmul.f32 0.5, %v747_v61 }
 0x159   :  { %499 = vtanh.f32 %v337_v24  ;;  %v297_v1 = vmul.f32 0.5, %v755_v5  ;;  %v301_v56 = vmul.f32 0.5, %v766_v18 }
 0x15a   :  { %501 = vtanh.f32 %v341_v42 }
 0x15d   :  { %v488_v44 = vpop.eup %487 }
 0x15e   :  { %v490_v27 = vpop.eup %489  ;;  %v354_v46 = vadd.f32 1.0, %v488_v44 }
 0x15f   :  { %v492_v47 = vpop.eup %491  ;;  %v358_v49 = vadd.f32 1.0, %v490_v27 }
 0x160   :  { %v494_v50 = vpop.eup %493  ;;  %v352_v52 = vadd.f32 1.0, %v492_v47  ;;  %v362_v54 = vmul.f32 %v354_v46, %v298_v45 }
 0x161   :  { %v496_v55 = vpop.eup %495  ;;  %v356_v57 = vadd.f32 1.0, %v494_v50  ;;  %v366_v58 = vmul.f32 %v358_v49, %v302_v48 }
 0x162   :  { %v498_v59 = vpop.eup %497  ;;  %v355_v43 = vadd.f32 1.0, %v496_v55  ;;  %v360_v23 = vmul.f32 %v352_v52, %v296_v51  ;;  %370 = vst [vmem:[#allocation8 + $0x10] sm:$0xff] %v362_v54 }
 0x163   :  { %v359_v41 = vadd.f32 1.0, %v498_v59  ;;  %v364_v63 = vmul.f32 %v356_v57, %v300_v38  ;;  %374 = vst [vmem:[#allocation8 + $0x30] sm:$0xff] %v366_v58  ;;  %v500_v0 = vpop.eup %499 }
 0x164   :  { %v363_v28 = vmul.f32 %v355_v43, %v299_v60  ;;  %368 = vst [vmem:[#allocation8] sm:$0xff] %v360_v23  ;;  %v353_v2 = vadd.f32 1.0, %v500_v0  ;;  %v502_v3 = vpop.eup %501 }
 0x165   :  { %v367_v37 = vmul.f32 %v359_v41, %v303_v62  ;;  %372 = vst [vmem:[#allocation8 + $0x20] sm:$0xff] %v364_v63  ;;  %v357_v61 = vadd.f32 1.0, %v502_v3 }
 0x166   :  { %371 = vst [vmem:[#allocation8 + $0x18] sm:$0xff] %v363_v28  ;;  %v361_v4 = vmul.f32 %v353_v2, %v297_v1 }
 0x167   :  { %375 = vst [vmem:[#allocation8 + $0x38] sm:$0xff] %v367_v37  ;;  %v365_v53 = vmul.f32 %v357_v61, %v301_v56 }
 0x168   :  { %369 = vst [vmem:[#allocation8 + $0x8] sm:$0xff] %v361_v4 }
 0x169   :  { %373 = vst [vmem:[#allocation8 + $0x28] sm:$0xff] %v365_v53 }
 0x16a   :  { %580 = shalt.err (!%p577_p0)
}
 0x16b   :  { %s581_s6 = scalar_lea.hbm %s806_s4, 1024 }
 0x16c   :  { %p582_p1 = scmp.ne.s32.totalorder %s806_s4, %s581_s6  ;;  %p585_p2 = scmp.lt.u32.totalorder %s581_s6, %s806_s4 }
 0x16e   :  { %p587_p3 = pnand %p585_p2, %p582_p1 }
 0x170   :  { %590 = shalt.err (!%p587_p3)
}
 0x171   :  { %387 = dma.vmem_to_hbm [thread:$0]  %s382_s28, 1024, %s806_s4, [#allocation4], %s601_s1, %s601_s1, %s602_s13  }
 0x172   :  { %595 = dma.done.wait [#allocation4], 1024  }
 0x173   :  { %596 = vsyncadd [#allocation4], 4294966272 }
 0x174   :  { %391 = vsyncpa [#allocation3], 1 }
 0x175   :  { %392 = vsyncpa [#allocation6], 1 }
 0x176   :  { %393 = vsyncpa [#allocation4], 1 }

</bundles_post_ra>
